<compile_context>
chip_gen: v7x
topology: tpu7x:2x2x1
jax: 0.10.0
libtpu: 0.0.40
codegen_flags: <defaults>
</compile_context>

<pallas_src>
import functools

import jax
import jax.numpy as jnp
from jax import lax
from jax.experimental import pallas as pl
from jax.experimental.pallas import tpu as pltpu


# --------------------------------------------------------------------------- #
# Kernel
# --------------------------------------------------------------------------- #
def _cmix_kernel(x_ref, xk_ref, wk_ref, wv_ref, o_ref, k_ref, acc_ref,
                 *, seq_len, compute_dtype):
    hi = pl.program_id(1)
    nh = pl.num_programs(1)

    # ---- once per token tile: time-shift mix -> k (cached), zero accumulator.
    @pl.when(hi == 0)
    def _():
        x = x_ref[...].astype(jnp.float32)                # (Mt, C)
        # prev[i] = x[i-1] via XLU sublane roll; rows at a sequence start -> 0.
        prev = pltpu.roll(x, shift=1, axis=0)
        row = lax.broadcasted_iota(jnp.int32, x.shape, 0)
        prev = jnp.where(row % seq_len == 0, jnp.zeros_like(prev), prev)
        xk = xk_ref[...].astype(jnp.float32)              # (1, C), broadcasts
        k = x + (prev - x) * xk
        k_ref[...] = k.astype(compute_dtype)
        acc_ref[...] = jnp.zeros_like(acc_ref)

    # ---- every hidden tile: h = relu(k @ Wk_tile)^2 ; acc += h @ Wv_tile.
    h = jnp.dot(k_ref[...], wk_ref[...], preferred_element_type=jnp.float32)
    h = jnp.maximum(h, 0.0)
    h = h * h
    acc_ref[...] += jnp.dot(h.astype(compute_dtype), wv_ref[...],
                            preferred_element_type=jnp.float32)

    # ---- last hidden tile: write the finished output block.
    @pl.when(hi == nh - 1)
    def _():
        o_ref[...] = acc_ref[...].astype(o_ref.dtype)


# --------------------------------------------------------------------------- #
# Tiling / VMEM helpers
# --------------------------------------------------------------------------- #
def _spec(shape, index_map, *, single_buffer=False):
    """BlockSpec; hi-invariant blocks request a single pipeline buffer."""
    if single_buffer and hasattr(pl, "Buffered"):
        try:
            return pl.BlockSpec(shape, index_map, pipeline_mode=pl.Buffered(1))
        except Exception:  # older jax without pipeline_mode: default buffering
            pass
    return pl.BlockSpec(shape, index_map)


def _vmem_budget():
    try:
        cap = int(pltpu.get_tpu_info().vmem_capacity_bytes)
    except Exception:
        cap = 64 << 20            # v7x per-TensorCore size: safe lower bound
    return int(cap * 0.85)        # leave headroom for compiler scratch / sems


def _vmem_estimate(mt, th, C, xb, wb, ob):
    """Upper-bound VMEM bytes for the chosen tiles (2 buffers per window)."""
    est = 2 * mt * C * xb          # x window
    est += 2 * C * 4               # x_k window
    est += 2 * C * th * wb         # Wk tiles (double-buffered)
    est += 2 * th * C * wb         # Wv tiles (double-buffered)
    est += 2 * mt * C * ob         # out window
    est += mt * C * 2              # cached k (bf16) scratch
    est += mt * C * 4              # f32 accumulator scratch
    return int(est * 1.15)         # ~15% headroom


def _pick_batch_block(B, Tp, target_rows):
    """Largest whole-batch-element M tile <= target_rows; prefer >=2 M tiles
    (keeps both v7x TensorCores busy via the 'parallel' grid axis)."""
    divisors = [d for d in range(1, B + 1) if B % d == 0]
    fitting = [d for d in divisors if d * Tp <= max(target_rows, Tp)]
    best = max(fitting)
    if B // best < 2:
        smaller = [d for d in fitting if B // d >= 2]
        if smaller:
            best = max(smaller)
    return best, best * Tp


def _pick_hidden_tile(H, requested):
    if H % 128 != 0:
        return H
    th = min(H, max(128, (requested // 128) * 128))
    while H % th != 0:
        th -= 128
    return th


def _shrink_hidden_tile(H, th):
    t = th - 128
    while t > 128 and H % t != 0:
        t -= 128
    return max(t, 128)


def _fit_tiles(B, Tp, C, H, target_rows, hidden_tile, xb, wb, ob, budget):
    bblk, mt = _pick_batch_block(B, Tp, target_rows)
    th = _pick_hidden_tile(H, hidden_tile)
    can_shrink_h = (H % 128 == 0)

    def est():
        return _vmem_estimate(mt, th, C, xb, wb, ob)

    # Shrink order: th down to 256 (keeps arithmetic intensity ~mt), then mt,
    # then th down to 128 as a last resort.
    while est() > budget and can_shrink_h and th > 256:
        th = _shrink_hidden_tile(H, th)
    while est() > budget and bblk > 1:
        nb_new = bblk - 1
        while nb_new > 1 and B % nb_new != 0:
            nb_new -= 1
        bblk = nb_new
        mt = bblk * Tp
    while est() > budget and can_shrink_h and th > 128:
        th = _shrink_hidden_tile(H, th)
    return bblk, mt, th


# --------------------------------------------------------------------------- #
# Wrapper
# --------------------------------------------------------------------------- #
def rwkv_cmix_x070(x, x_k, w_key, w_value, *, compute_dtype=jnp.bfloat16,
                   target_rows=1024, hidden_tile=512, out_dtype=None):
    """x: (B,T,C); x_k: (...,C); w_key: (C,4C); w_value: (4C,C) -> (B,T,C)."""
    B, T, C = x.shape
    H = w_key.shape[1]
    assert w_key.shape == (C, H) and w_value.shape == (H, C)
    out_dtype = x.dtype if out_dtype is None else out_dtype

    # Pad T up to a multiple of 8 so every M tile satisfies the (8,128)
    # constraint (no whole-problem fallback tile); padded rows are sliced off.
    Tp = -(-T // 8) * 8
    if Tp != T:
        x = jnp.pad(x, ((0, 0), (0, Tp - T), (0, 0)))

    # Ship activations over HBM in the compute dtype (halves DMA + VMEM).
    x2 = x.reshape(B * Tp, C).astype(compute_dtype)
    xk2 = jnp.asarray(x_k, jnp.float32).reshape(1, C)   # keep a sublane dim
    # Accept pre-cast weights; only cast when the caller passed another dtype.
    wk = w_key if w_key.dtype == compute_dtype else w_key.astype(compute_dtype)
    wv = w_value if w_value.dtype == compute_dtype else w_value.astype(compute_dtype)

    xb = jnp.dtype(compute_dtype).itemsize
    wb = jnp.dtype(compute_dtype).itemsize
    ob = jnp.dtype(out_dtype).itemsize
    budget = _vmem_budget()
    bblk, mt, th = _fit_tiles(B, Tp, C, H, target_rows, hidden_tile,
                              xb, wb, ob, budget)
    nb = (B * Tp) // mt
    nh = H // th
    vmem_limit = min(max(_vmem_estimate(mt, th, C, xb, wb, ob), 32 << 20),
                     budget)

    kernel = functools.partial(_cmix_kernel, seq_len=Tp,
                               compute_dtype=compute_dtype)

    out2 = pl.pallas_call(
        kernel,
        out_shape=jax.ShapeDtypeStruct((B * Tp, C), out_dtype),
        grid_spec=pltpu.PrefetchScalarGridSpec(
            num_scalar_prefetch=0,
            grid=(nb, nh),                          # H reduction axis last
            in_specs=[
                _spec((mt, C), lambda bi, hi: (bi, 0), single_buffer=True),
                _spec((1, C), lambda bi, hi: (0, 0), single_buffer=True),
                _spec((C, th), lambda bi, hi: (0, hi)),   # Wk tile
                _spec((th, C), lambda bi, hi: (hi, 0)),   # Wv tile
            ],
            out_specs=_spec((mt, C), lambda bi, hi: (bi, 0), single_buffer=True),
            scratch_shapes=[
                pltpu.VMEM((mt, C), compute_dtype),   # cached k across H tiles
                pltpu.VMEM((mt, C), jnp.float32),     # f32 output accumulator
            ],
        ),
        compiler_params=pltpu.CompilerParams(
            dimension_semantics=("parallel", "arbitrary"),
            vmem_limit_bytes=vmem_limit,
        ),
    )(x2, xk2, wk, wv)

    out = out2.reshape(B, Tp, C)
    if Tp != T:
        out = out[:, :T, :]
    return out


# --------------------------------------------------------------------------- #
# Reference + test
# --------------------------------------------------------------------------- #
def reference(x, x_k, w_key, w_value):
    prev = jnp.pad(x[:, :-1, :], ((0, 0), (1, 0), (0, 0)))
    k = x + (prev - x) * jnp.reshape(x_k, (1, 1, -1))
    h = jnp.maximum(k @ w_key, 0.0) ** 2
    return h @ w_value


if __name__ == "__main__":
    # Module config: n_embd=32, hidden=4*32=128, n_layer=2, layer_id=0.
    B, T, C = 2, 8, 32
    H = 4 * C
    n_layer, layer_id = 2, 0

    # Deterministic x_k init (matches the module's __init__ formula).
    ratio_1_to_almost0 = 1.0 - layer_id / n_layer
    ddd = (jnp.arange(C, dtype=jnp.float32) / C).reshape(1, 1, C)
    x_k = 1.0 - jnp.power(ddd, ratio_1_to_almost0 ** 4)      # (1,1,C)

    key0 = jax.random.PRNGKey(0)
    k1, k2, k3 = jax.random.split(key0, 3)
    # Linear(C, 4C, bias=False) / Linear(4C, C, bias=False): stored as x @ W.
    w_key = jax.random.normal(k1, (H, C), jnp.float32).T * (C ** -0.5)    # (C, 4C)
    w_value = jax.random.normal(k2, (C, H), jnp.float32).T * (H ** -0.5)  # (4C, C)
    x = jax.random.normal(k3, (B, T, C), jnp.float32)

    # Pre-cast the weights ONCE (no per-call astype inside the hot path).
    wk_bf16 = w_key.astype(jnp.bfloat16)
    wv_bf16 = w_value.astype(jnp.bfloat16)

    out = rwkv_cmix_x070(x, x_k, wk_bf16, wv_bf16)
    out = jax.block_until_ready(out)

    ref = reference(x, x_k, w_key, w_value)
    assert out.shape == (B, T, C)
    # bf16 activations/weights on the MXU with f32 accumulation vs f32 ref.
    max_ref = float(jnp.max(jnp.abs(ref)))
    max_err = float(jnp.max(jnp.abs(out.astype(jnp.float32) - ref)))
    assert max_err <= 0.05 * max_ref + 1e-5, (
        f"mismatch vs reference: max abs err {max_err} (ref scale {max_ref})")

    print("KERNEL_OK")
</pallas_src>

<mosaic_0001>
module attributes {stable_mosaic.version = 11 : i64} {
  func.func @_cmix_kernel(%arg0: i32, %arg1: i32, %arg2: memref<8x32xbf16, #tpu.memory_space<vmem>>, %arg3: memref<1x32xf32, #tpu.memory_space<vmem>>, %arg4: memref<32x128xbf16, #tpu.memory_space<vmem>>, %arg5: memref<128x32xbf16, #tpu.memory_space<vmem>>, %arg6: memref<8x32xf32, #tpu.memory_space<vmem>>, %arg7: memref<8x32xbf16, #tpu.memory_space<vmem>>, %arg8: memref<8x32xf32, #tpu.memory_space<vmem>>) attributes {dimension_semantics = [#tpu.dimension_semantics<parallel>, #tpu.dimension_semantics<arbitrary>], iteration_bounds = array<i64: 2, 1>, scalar_prefetch = 0 : i64, scratch_operands = 2 : i64, tpu.core_type = #tpu.core_type<tc>, window_params = [{pipeline_mode = #tpu.pipeline_mode<synchronous>, transform_indices = @transform_0, window_bounds = array<i64: 8, 32>}, {pipeline_mode = #tpu.pipeline_mode<synchronous>, transform_indices = @transform_1, window_bounds = array<i64: 1, 32>}, {transform_indices = @transform_2, window_bounds = array<i64: 32, 128>}, {transform_indices = @transform_3, window_bounds = array<i64: 128, 32>}, {pipeline_mode = #tpu.pipeline_mode<synchronous>, transform_indices = @transform_4, window_bounds = array<i64: 8, 32>}]} {
    %c0_i32 = arith.constant 0 : i32
    %0 = arith.cmpi eq, %arg1, %c0_i32 : i32
    %1 = arith.extui %0 : i1 to i32
    %c0_i32_0 = arith.constant 0 : i32
    %2 = arith.cmpi ne, %1, %c0_i32_0 : i32
    scf.if %2 {
      %c0_14 = arith.constant 0 : index
      %c0_15 = arith.constant 0 : index
      %18 = vector.load %arg2[%c0_14, %c0_15] : memref<8x32xbf16, #tpu.memory_space<vmem>>, vector<8x32xbf16>
      %19 = arith.extf %18 : vector<8x32xbf16> to vector<8x32xf32>
      %c1_i32 = arith.constant 1 : i32
      %20 = tpu.dynamic_rotate %19 by %c1_i32 dim 0 : vector<8x32xf32>, i32 -> vector<8x32xf32>
      %21 = tpu.iota {dimensions = array<i32: 0>} : vector<8x32xi32>
      %c8_i32 = arith.constant 8 : i32
      %c0_i32_16 = arith.constant 0 : i32
      %22 = arith.cmpi eq, %c8_i32, %c0_i32_16 : i32
      %c1_i32_17 = arith.constant 1 : i32
      %23 = arith.select %22, %c1_i32_17, %c8_i32 : i32
      %24 = vector.broadcast %23 : i32 to vector<8x32xi32>
      %25 = arith.remsi %21, %24 : vector<8x32xi32>
      %c0_i32_18 = arith.constant 0 : i32
      %26 = vector.broadcast %c0_i32_18 : i32 to vector<8x32xi32>
      %27 = arith.cmpi ne, %25, %26 : vector<8x32xi32>
      %c0_i32_19 = arith.constant 0 : i32
      %28 = vector.broadcast %c0_i32_19 : i32 to vector<8x32xi32>
      %29 = arith.cmpi slt, %25, %28 : vector<8x32xi32>
      %c0_i32_20 = arith.constant 0 : i32
      %30 = arith.cmpi slt, %23, %c0_i32_20 : i32
      %31 = vector.broadcast %30 : i1 to vector<8x32xi1>
      %32 = vector.broadcast %31 : vector<8x32xi1> to vector<8x32xi1>
      %33 = arith.xori %29, %32 : vector<8x32xi1>
      %34 = arith.andi %33, %27 : vector<8x32xi1>
      %35 = vector.broadcast %23 : i32 to vector<8x32xi32>
      %36 = arith.addi %25, %35 : vector<8x32xi32>
      %37 = arith.select %34, %36, %25 : vector<8x32xi1>, vector<8x32xi32>
      %c0_i32_21 = arith.constant 0 : i32
      %38 = vector.broadcast %c0_i32_21 : i32 to vector<8x32xi32>
      %39 = arith.cmpi eq, %37, %38 : vector<8x32xi32>
      %cst_22 = arith.constant 0.000000e+00 : f32
      %40 = vector.broadcast %cst_22 : f32 to vector<8x32xf32>
      %41 = arith.select %39, %40, %20 : vector<8x32xi1>, vector<8x32xf32>
      %c0_23 = arith.constant 0 : index
      %c0_24 = arith.constant 0 : index
      %42 = vector.load %arg3[%c0_23, %c0_24] : memref<1x32xf32, #tpu.memory_space<vmem>>, vector<1x32xf32>
      %43 = arith.subf %41, %19 : vector<8x32xf32>
      %44 = vector.broadcast %42 : vector<1x32xf32> to vector<8x32xf32>
      %45 = arith.mulf %43, %44 : vector<8x32xf32>
      %46 = arith.addf %19, %45 : vector<8x32xf32>
      %47 = arith.truncf %46 : vector<8x32xf32> to vector<8x32xbf16>
      %c0_25 = arith.constant 0 : index
      %c0_26 = arith.constant 0 : index
      %48 = vector.load %arg7[%c0_25, %c0_26] : memref<8x32xbf16, #tpu.memory_space<vmem>>, vector<8x32xbf16>
      tpu.vector_store %arg7[%c0_25, %c0_26], %47 {strides = array<i32>} : memref<8x32xbf16, #tpu.memory_space<vmem>>, vector<8x32xbf16>,
      %cst_27 = arith.constant 0.000000e+00 : f32
      %49 = vector.broadcast %cst_27 : f32 to vector<8x32xf32>
      %c0_28 = arith.constant 0 : index
      %c0_29 = arith.constant 0 : index
      %50 = vector.load %arg8[%c0_28, %c0_29] : memref<8x32xf32, #tpu.memory_space<vmem>>, vector<8x32xf32>
      tpu.vector_store %arg8[%c0_28, %c0_29], %49 {strides = array<i32>} : memref<8x32xf32, #tpu.memory_space<vmem>>, vector<8x32xf32>,
    } else {
    }
    %c0 = arith.constant 0 : index
    %c0_1 = arith.constant 0 : index
    %3 = vector.load %arg7[%c0, %c0_1] : memref<8x32xbf16, #tpu.memory_space<vmem>>, vector<8x32xbf16>
    %c0_2 = arith.constant 0 : index
    %c0_3 = arith.constant 0 : index
    %4 = vector.load %arg4[%c0_2, %c0_3] : memref<32x128xbf16, #tpu.memory_space<vmem>>, vector<32x128xbf16>
    %cst = arith.constant dense<0.000000e+00> : vector<8x128xf32>
    %5 = tpu.matmul %3, %4, %cst {dimension_numbers = #tpu.dot_dimension_numbers<[1], [0], [0], [1], [0, 0, 1, 1], [], []>} : vector<8x32xbf16>, vector<32x128xbf16>, vector<8x128xf32> -> vector<8x128xf32>
    %cst_4 = arith.constant 0.000000e+00 : f32
    %6 = vector.broadcast %cst_4 : f32 to vector<8x128xf32>
    %7 = arith.maximumf %5, %6 : vector<8x128xf32>
    %8 = arith.mulf %7, %7 : vector<8x128xf32>
    %c0_5 = arith.constant 0 : index
    %c0_6 = arith.constant 0 : index
    %9 = vector.load %arg8[%c0_5, %c0_6] : memref<8x32xf32, #tpu.memory_space<vmem>>, vector<8x32xf32>
    %10 = arith.truncf %8 : vector<8x128xf32> to vector<8x128xbf16>
    %c0_7 = arith.constant 0 : index
    %c0_8 = arith.constant 0 : index
    %11 = vector.load %arg5[%c0_7, %c0_8] : memref<128x32xbf16, #tpu.memory_space<vmem>>, vector<128x32xbf16>
    %cst_9 = arith.constant dense<0.000000e+00> : vector<8x32xf32>
    %12 = tpu.matmul %10, %11, %cst_9 {dimension_numbers = #tpu.dot_dimension_numbers<[1], [0], [0], [1], [0, 0, 1, 1], [], []>} : vector<8x128xbf16>, vector<128x32xbf16>, vector<8x32xf32> -> vector<8x32xf32>
    %13 = arith.addf %9, %12 : vector<8x32xf32>
    %c0_10 = arith.constant 0 : index
    %c0_11 = arith.constant 0 : index
    %14 = vector.load %arg8[%c0_10, %c0_11] : memref<8x32xf32, #tpu.memory_space<vmem>>, vector<8x32xf32>
    tpu.vector_store %arg8[%c0_10, %c0_11], %13 {strides = array<i32>} : memref<8x32xf32, #tpu.memory_space<vmem>>, vector<8x32xf32>,
    %c0_i32_12 = arith.constant 0 : i32
    %15 = arith.cmpi eq, %arg1, %c0_i32_12 : i32
    %16 = arith.extui %15 : i1 to i32
    %c0_i32_13 = arith.constant 0 : i32
    %17 = arith.cmpi ne, %16, %c0_i32_13 : i32
    scf.if %17 {
      %c0_14 = arith.constant 0 : index
      %c0_15 = arith.constant 0 : index
      %18 = vector.load %arg8[%c0_14, %c0_15] : memref<8x32xf32, #tpu.memory_space<vmem>>, vector<8x32xf32>
      %c0_16 = arith.constant 0 : index
      %c0_17 = arith.constant 0 : index
      %19 = vector.load %arg6[%c0_16, %c0_17] : memref<8x32xf32, #tpu.memory_space<vmem>>, vector<8x32xf32>
      tpu.vector_store %arg6[%c0_16, %c0_17], %18 {strides = array<i32>} : memref<8x32xf32, #tpu.memory_space<vmem>>, vector<8x32xf32>,
    } else {
    }
    return
  }
  func.func @transform_0(%arg0: i32, %arg1: i32) -> (i32, i32) {
    %c0_i32 = arith.constant 0 : i32
    %c0_i32_0 = arith.constant 0 : i32
    return %arg0, %c0_i32 : i32, i32
  }
  func.func @transform_1(%arg0: i32, %arg1: i32) -> (i32, i32) {
    %c0_i32 = arith.constant 0 : i32
    %c0_i32_0 = arith.constant 0 : i32
    %c0_i32_1 = arith.constant 0 : i32
    return %c0_i32, %c0_i32_0 : i32, i32
  }
  func.func @transform_2(%arg0: i32, %arg1: i32) -> (i32, i32) {
    %c0_i32 = arith.constant 0 : i32
    %c0_i32_0 = arith.constant 0 : i32
    return %c0_i32, %arg1 : i32, i32
  }
  func.func @transform_3(%arg0: i32, %arg1: i32) -> (i32, i32) {
    %c0_i32 = arith.constant 0 : i32
    %c0_i32_0 = arith.constant 0 : i32
    return %arg1, %c0_i32 : i32, i32
  }
  func.func @transform_4(%arg0: i32, %arg1: i32) -> (i32, i32) {
    %c0_i32 = arith.constant 0 : i32
    %c0_i32_0 = arith.constant 0 : i32
    return %arg0, %c0_i32 : i32, i32
  }
}

</mosaic_0001>

<bundles_post_ra>
// kernel: tpu_custom_call.1
= control target key start
LH: loop header
LB: loop body
LE: loop exit
PB: predicated region body
PF: predicated region fallthrough
CT: control target
= control target key end

     0   :  { %9 = vsyncpa [#allocation5], 0  ;;  %s760_s15 = smov 0   ;;  %s762_s16 = smov 0   ;;  %s877_s0 = inlined_call_operand.vmem [shape: bf16[16,32], index: 0, kind: input, shape index: {}]   ;;  %s878_s1 = inlined_call_operand.vmem [shape: f32[1,32], index: 1, kind: input, shape index: {}]   ;;  %s879_s2 = inlined_call_operand.vmem [shape: bf16[32,128], index: 2, kind: input, shape index: {}]   ;;  %s880_s3 = inlined_call_operand.vmem [shape: bf16[128,32], index: 3, kind: input, shape index: {}]   ;;  %s881_s4 = inlined_call_operand.hbm [shape: f32[16,32], index: 4, kind: output, shape index: {}]  }
   0x1   :  { %s764_s17 = smov 0   ;;  %s766_s18 = smov 0  }
   0x2   :  { %s768_s19 = smov 0  }
   0x3 LB: > { %s544_s20 = sadd.s32 4294967295, %s730_s19   ;;  %s27_s21 = sadd.s32 1, %s726_s18  ;;  %s730_s19 = sphi %s768_s19, %s15_s19   ;;  %s726_s18 = sphi %s766_s18, %s886_s18   ;;  %s722_s17 = sphi %s764_s17, %s885_s17   ;;  %s718_s16 = sphi %s762_s16, %s884_s16   ;;  %s714_s15 = sphi %s760_s15, %s883_s15  }
   0x4   : > { %p29_p0 = scmp.ge.s32.totalorder %s27_s21, 2  ;;  %s133_s22 = sadd.s32 1, %s718_s16 }
   0x5   : > { %p143_p1 = scmp.ne.s32.totalorder %s718_s16, %s714_s15  ;;  %p144_p2 = scmp.eq.s32.totalorder %s544_s20, 1 }
   0x6   : > { %s888_s21 = smov (%p29_p0, %s27_s21), 0  ;;  %p548_p4 = scmp.ge.s32.totalorder %s730_s19, 1 }
   0x7   : > { %p789_p3 = por %p144_p2, %p143_p1  ;;  %s130_s24 = ssub.s32 %s726_s18, %s888_s21 }
   0x8   : > { %p194_p5 = scmp.lt.s32.totalorder %s730_s19, 3  ;;  %p131_p6 = scmp.eq.s32.totalorder %s130_s24, 0 }
   0xa   : > { %p195_p7 = pnand %p548_p4, %p194_p5 }
   0xb   : > { %s798_s25 = scalar_select %p131_p6, %s718_s16, %s133_s22  }
   0xc   : > { %198 = sbr.rel (%p195_p7) target bundleno = 501 (0x1f5), region = 36  ;;  %v650_v0 = vld [vmem:[%s879_s2] sm:$0xff] (!%p195_p7)   ;;  %v245_v1 = vlaneseq (!%p195_p7)  ;;  %v732_v2 = vmov (!%p195_p7), 0.0   ;;  %v651_v3 = vld [vmem:[%s879_s2 + $0x8] sm:$0xff] (!%p195_p7)   ;;  %vm733_vm0 = vmmov (!%p195_p7), 0   ;;  %p223_p8 = scmp.lt.s32.totalorder (!%p195_p7), %s722_s17, 1 }
   0xd   : > { %577 = vmatprep.subr.bf16.mxu0 (!%p195_p7), %v732_v2  ;;  %585 = vmatprep.subr.bf16.mxu1 (!%p195_p7), %v732_v2  ;;  %vm274_vm1 = vcmask (!%p195_p7), 261120   ;;  %v652_v5 = vld [vmem:[%s880_s3] sm:$0xff] (!%p195_p7)   ;;  %v653_v7 = vld [vmem:[%s880_s3 + $0x8] sm:$0xff] (!%p195_p7)   ;;  %v654_v10 = vld [vmem:[%s880_s3 + $0x10] sm:$0xff] (!%p195_p7)   ;;  %vm272_vm3 = vcmask (!%p195_p7), 257024   ;;  %s562_s8 = sshll.u32 (!%p195_p7), %s722_s17, 7 }
   0xe   : > { %578 = vmatpush3.bf16.msra.mxu0 (!%p195_p7), %v650_v0  ;;  %581 = vmatprep.mubr.msk.bf16.mxu0 (!%p195_p7), %vm733_vm0, %v732_v2  ;;  %v246_v4 = vshrl.u32 (!%p195_p7), %v245_v1, 7  ;;  %275 = vst.msk [vmem:[#allocation3] sm:$0xff] (!%p195_p7), %vm274_vm1, %v732_v2  ;;  %v550_v13 = vld [vmem:[%s878_s1] ss:$0 sm:$0xff] (!%p195_p7)  ;;  %v655_v14 = vld [vmem:[%s880_s3 + $0x18] sm:$0xff] (!%p195_p7)   ;;  %v657_v20 = vld [vmem:[%s880_s3 + $0x28] sm:$0xff] (!%p195_p7)   ;;  %s459_s13 = scalar_lea.hbm (!%p195_p7), %s881_s4, %s562_s8 }
   0xf   : > { %579 = vmatprep.subr.bf16.mxu0 (!%p195_p7), %v732_v2  ;;  %601 = vmatprep.mubr.msk.bf16.mxu1 (!%p195_p7), %vm733_vm0, %v732_v2  ;;  %v656_v17 = vld [vmem:[%s880_s3 + $0x20] sm:$0xff] (!%p195_p7)   ;;  %v658_v22 = vld [vmem:[%s880_s3 + $0x30] sm:$0xff] (!%p195_p7)   ;;  %v659_v23 = vld [vmem:[%s880_s3 + $0x38] sm:$0xff] (!%p195_p7)  }
  0x10   : > { %v251_v6 = vand.u32 (!%p195_p7), 7, %v246_v4  ;;  %586 = vmatpush3.bf16.msra.mxu1 (!%p195_p7), %v652_v5 }
  0x11   : > { %587 = vmatprep.subr.bf16.mxu1 (!%p195_p7), %v732_v2 }
  0x12   : > { %580 = vmatpush3.bf16.msra.mxu0 (!%p195_p7), %v651_v3  ;;  %vm259_vm2 = vcmp.eq.s32.totalorder (!%p195_p7), %v251_v6, 0 }
  0x13   : > { %s224_s6 = scalar_select %p223_p8, %s722_s17, 1 }
  0x14   : > { %588 = vmatpush3.bf16.msra.mxu1 %v653_v7 }
  0x15   : > { %s549_s9 = sshll.u32 %s224_s6, 2  ;;  %589 = vmatprep.subr.bf16.mxu1 %v732_v2  ;;  %v339_v31 = vld [vmem:[#allocation3] sm:$0xff] }
  0x16   : > { %s226_s12 = scalar_lea.vmem %s877_s0, %s549_s9  ;;  %s734_s9 = smov [#allocation4]  }
  0x17   : > { %v242_v8 = vld [vmem:[%s226_s12] sm:$0xf]  ;;  %s461_s10 = sshll.u32 %s734_s9, 4  ;;  %s462_s10 = int_to_ptr.vmem [resolvable:$true] %s461_s10 }
  0x18   : > { %v243_v9 = vunpack.c.l.bf16 %v242_v8  ;;  %590 = vmatpush3.bf16.msra.mxu1 %v654_v10  ;;  %s660_s14 = scalar_lea.vmem %s462_s10, 128  ;;  %p667_p12 = scmp.lt.s32.totalorder %s462_s10, %s462_s10 }
  0x19   : > { %591 = vmatprep.subr.bf16.mxu1 %v732_v2  ;;  %p661_p9 = scmp.ne.s32.totalorder %s462_s10, %s660_s14  ;;  %p668_p13 = scmp.lt.s32.totalorder %s660_s14, %s660_s14 }
  0x1a   : > { %v244_v11 = vrot.slane %v243_v9, 7 }
  0x1b   : > { %p662_p10 = pnand %p661_p9, %p789_p3  ;;  %p669_p0 = por %p668_p13, %p667_p12 }
  0x1c   : > { %v260_v12 = vsel %vm259_vm2, 0.0, %v244_v11  ;;  %592 = vmatpush3.bf16.msra.mxu1 %v655_v14 }
  0x1d   : > { %v262_v15 = vsub.f32 %v260_v12, %v243_v9  ;;  %593 = vmatprep.subr.bf16.mxu1 %v732_v2  ;;  %p663_p11 = pneg %p662_p10 }
  0x1f   : > { %v269_v16 = vmul.f32 %v550_v13, %v262_v15  ;;  %p670_p1 = pnand %p669_p0, %p663_p11 }
  0x20   : > { %594 = vmatpush3.bf16.msra.mxu1 %v656_v17 }
  0x21   : > { %v270_v18 = vadd.f32 %v269_v16, %v243_v9  ;;  %595 = vmatprep.subr.bf16.mxu1 %v732_v2 }
  0x23   : > { %v271_v19 = vpack.c.bf16 %v270_v18, %v270_v18 }
  0x24   : > { %596 = vmatpush3.bf16.msra.mxu1 %v657_v20 }
  0x25   : > { %273 = vst.msk [vmem:[#allocation2] sm:$0xf] %vm272_vm3, %v271_v19  ;;  %597 = vmatprep.subr.bf16.mxu1 %v732_v2 }
  0x28   : > { %598 = vmatpush3.bf16.msra.mxu1 %v658_v22 }
  0x29   : > { %599 = vmatprep.subr.bf16.mxu1 %v732_v2 }
  0x2c   : > { %v276_v21 = vld [vmem:[#allocation2] sm:$0xf]  ;;  %600 = vmatpush3.bf16.msra.mxu1 %v659_v23 }
  0x2d   : > { %582 = vmatmul.mubr.msk.bf16.vlgmr.msra.gmra.mrb[0].mxu0 %vm274_vm1, %v276_v21 }
 0x100   : > { %v331_v24 = vpop.f32.mrb[0].mxu0 }
 0x101   : > { %v337_v25 = vmax.f32 %v331_v24, 0.0  ;;  %v583_v26 = vpop.f32.mrb[1].mxu0 }
 0x102   : > { %v334_v27 = vpop.f32.mrb[2].mxu0 }
 0x103   : > { %v338_v28 = vmul.f32 %v337_v25, %v337_v25  ;;  %v584_v29 = vpop.f32.mrb[3].mxu0 }
 0x105   : > { %v340_v30 = vpack.c.bf16 %v338_v28, %v338_v28 }
 0x107   : > { %602 = vmatmul.mubr.bf16.vlgmr.msra.gmra.mrb[0].mxu1 %v340_v30 }
 0x1da   : > { %v439_v32 = vpop.f32.mrb[0].mxu1 }
 0x1db   : > { %v445_v33 = vadd.f32 %v439_v32, %v339_v31  ;;  %v603_v34 = vpop.f32.mrb[1].mxu1 }
 0x1dc   : > { %v442_v35 = vpop.f32.mrb[2].mxu1 }
 0x1dd   : > { %446 = vst.msk [vmem:[#allocation3] sm:$0xff] %vm274_vm1, %v445_v33  ;;  %v604_v36 = vpop.f32.mrb[3].mxu1 }
 0x1e4   : > { %v450_v37 = vld [vmem:[#allocation3] sm:$0xff] }
 0x1e5   : > { %451 = vst.msk [vmem:[#allocation4] sm:$0xff] %vm274_vm1, %v450_v37 }
 0x1e6   : > { %673 = shalt.err (!%p670_p1)
}
 0x1e7   : > { %s674_s17 = scalar_lea.hbm %s459_s13, 128  ;;  %s678_s22 = scalar_lea.hbm %s881_s4, 256 }
 0x1e8   : > { %p675_p2 = scmp.ne.s32.totalorder %s459_s13, %s674_s17  ;;  %p679_p6 = scmp.lt.u32.totalorder %s459_s13, %s881_s4 }
 0x1e9   : > { %p680_p7 = scmp.lt.u32.totalorder %s678_s22, %s674_s17  ;;  %p682_p9 = scmp.lt.u32.totalorder %s674_s17, %s459_s13 }
 0x1ea   : > { %p676_p4 = pnand %p675_p2, %p789_p3 }
 0x1eb   : > { %p681_p8 = por %p680_p7, %p679_p6 }
 0x1ec   : > { %p677_p5 = pneg %p676_p4 }
 0x1ed   : > { %p683_p10 = por %p682_p9, %p681_p8 }
 0x1ef   : > { %p684_p11 = pnand %p683_p10, %p677_p5 }
 0x1f1   : > { %687 = shalt.err (!%p684_p11)
}
 0x1f2   : > { %605 = dma.vmem_to_hbm [thread:$0]  (%p789_p3), %s462_s10, 128, %s459_s13, [#allocation5]  }
 0x1f3   : > { %709 = dma.done.wait (%p789_p3), [#allocation5], 128  }
 0x1f4   : > { %711 = vsyncadd (%p789_p3), [#allocation5], 4294967168 }
 0x1f5 PF: > { %s15_s19 = sadd.s32 1, %s730_s19   ;;  %s883_s15 = smov %s718_s16 }
 0x1f6   : > { %p12_p12 = scmp.ge.s32.totalorder %s15_s19, 4   ;;  %s884_s16 = smov %s798_s25 }
 0x1f7   : > { %s885_s17 = smov %s726_s18  ;;  %s886_s18 = smov %s888_s21 }
 0x1f8   :  { %14 = sbr.rel (!%p12_p12) target bundleno = 3 (0x3), region = 78 }
 0x1ff   :  { %474 = vsyncpa [#allocation5], 1 }
 0x200   :  { %476 = vsyncpa [#allocation5 + $0x1], 1 }

</bundles_post_ra>
